<compile_context>
chip_gen: v6e
topology: v6e:2x2x1
jax: 0.10.0
libtpu: 0.0.40
codegen_flags: <defaults>
</compile_context>

<pallas_src>
import jax
import jax.numpy as jnp
from jax.experimental import pallas as pl
from jax.experimental.pallas import tpu as pltpu

# The original script defines `num_classes` globally; fixed here deterministically.
# With NUM_CLASSES != 2 the output has the same shape/dtype as the input,
# values in {-1, +1}.
NUM_CLASSES = 10

_LANE_WIDTH = 512                    # lane-dense slab width (multiple of 128)
_TARGET_BLOCK_BYTES = 2 * 1024 * 1024  # ~2 MiB per block: v7x-safe, double-buffer friendly


def _binary_tanh_kernel(x_ref, o_ref):
    x = x_ref[...]
    one = jnp.ones((), dtype=x.dtype)
    # BinarizeF.forward: >= 0 -> +1, < 0 -> -1. (hardtanh is a no-op for the sign.)
    out = jnp.where(x >= 0, one, -one)
    if NUM_CLASSES == 2:
        # (out + 1) / 2 -> values in {0, 1}
        out = (out + one) * jnp.asarray(0.5, dtype=x.dtype)
    o_ref[...] = out.astype(o_ref.dtype)


def binary_tanh(x):
    """Pallas BinaryTanh forward. x: float array, any rank (NCHW typical)."""
    orig_shape = x.shape
    orig_dtype = x.dtype
    n = x.size
    itemsize = jnp.dtype(orig_dtype).itemsize

    c = _LANE_WIDTH
    # Rows of the lane-dense slab (ceil so a ragged tail gets padded).
    rows = -(-n // c)

    # Rows per tile: ~2 MiB per block, multiple of 8 (sublane), capped at the
    # (sublane-rounded) total row count for small inputs.
    target_rows = max(8, (_TARGET_BLOCK_BYTES // (c * itemsize)) // 8 * 8)
    rows_rounded = -(-rows // 8) * 8
    tile_r = min(target_rows, rows_rounded)

    # Pad rows to a multiple of tile_r so every block is full (no masked stores).
    rows_padded = -(-rows // tile_r) * tile_r
    padded_n = rows_padded * c

    flat = x.reshape(-1)
    if padded_n != n:
        flat = jnp.pad(flat, (0, padded_n - n))
    x2d = flat.reshape(rows_padded, c)

    grid = (rows_padded // tile_r,)
    out2d = pl.pallas_call(
        _binary_tanh_kernel,
        out_shape=jax.ShapeDtypeStruct(x2d.shape, orig_dtype),
        grid=grid,
        in_specs=[pl.BlockSpec((tile_r, c), lambda i: (i, 0))],
        out_specs=pl.BlockSpec((tile_r, c), lambda i: (i, 0)),
        compiler_params=pltpu.CompilerParams(
            dimension_semantics=("parallel",)),
    )(x2d)

    out = out2d.reshape(-1)[:n].reshape(orig_shape)
    if NUM_CLASSES == 2:
        # torch .squeeze(): drop all size-1 dims.
        out = jnp.squeeze(out)
    return out


def _reference(x):
    y = jnp.clip(x, -1.0, 1.0)
    out = jnp.where(y >= 0, 1.0, -1.0).astype(x.dtype)
    if NUM_CLASSES == 2:
        out = ((out + 1.0) * 0.5).astype(x.dtype)
        out = jnp.squeeze(out)
    return out


if __name__ == "__main__":
    key = jax.random.PRNGKey(0)

    # NCHW input, small shapes.
    x = jax.random.normal(key, (2, 4, 16, 16), dtype=jnp.float32) * 2.0
    out = jax.block_until_ready(binary_tanh(x))
    ref = _reference(x)
    assert out.shape == ref.shape, (out.shape, ref.shape)
    assert out.dtype == ref.dtype, (out.dtype, ref.dtype)
    assert bool(jnp.all(out == ref)), "mismatch vs reference (f32)"

    # Ragged / non-multiple-of-128 shape exercises the pad-and-slice path.
    x2 = jax.random.normal(jax.random.PRNGKey(0), (3, 5, 7, 9), dtype=jnp.bfloat16)
    out2 = jax.block_until_ready(binary_tanh(x2))
    ref2 = _reference(x2)
    assert out2.shape == ref2.shape, (out2.shape, ref2.shape)
    assert out2.dtype == ref2.dtype, (out2.dtype, ref2.dtype)
    assert bool(jnp.all(out2 == ref2)), "mismatch vs reference (bf16 ragged)"

    print("KERNEL_OK")
</pallas_src>

<mosaic_0001>
module attributes {stable_mosaic.version = 11 : i64} {
  func.func @_binary_tanh_kernel(%arg0: i32, %arg1: memref<8x512xf32, #tpu.memory_space<vmem>>, %arg2: memref<8x512xf32, #tpu.memory_space<vmem>>) attributes {dimension_semantics = [#tpu.dimension_semantics<parallel>], iteration_bounds = array<i64: 1>, scalar_prefetch = 0 : i64, scratch_operands = 0 : i64, tpu.core_type = #tpu.core_type<tc>, window_params = [{transform_indices = @transform_0, window_bounds = array<i64: 8, 512>}, {transform_indices = @transform_1, window_bounds = array<i64: 8, 512>}]} {
    %c0 = arith.constant 0 : index
    %c0_0 = arith.constant 0 : index
    %0 = vector.load %arg1[%c0, %c0_0] : memref<8x512xf32, #tpu.memory_space<vmem>>, vector<8x512xf32>
    %cst = arith.constant 0.000000e+00 : f32
    %1 = vector.broadcast %cst : f32 to vector<8x512xf32>
    %2 = arith.cmpf oge, %0, %1 : vector<8x512xf32>
    %cst_1 = arith.constant 0.000000e+00 : f32
    %cst_2 = arith.constant 1.000000e+00 : f32
    %3 = arith.subf %cst_1, %cst_2 : f32
    %cst_3 = arith.constant 1.000000e+00 : f32
    %4 = vector.broadcast %cst_3 : f32 to vector<8x512xf32>
    %5 = vector.broadcast %3 : f32 to vector<8x512xf32>
    %6 = arith.select %2, %4, %5 : vector<8x512xi1>, vector<8x512xf32>
    %c0_4 = arith.constant 0 : index
    %c0_5 = arith.constant 0 : index
    %7 = vector.load %arg2[%c0_4, %c0_5] : memref<8x512xf32, #tpu.memory_space<vmem>>, vector<8x512xf32>
    tpu.vector_store %arg2[%c0_4, %c0_5], %6 {strides = array<i32>} : memref<8x512xf32, #tpu.memory_space<vmem>>, vector<8x512xf32>,
    return
  }
  func.func @transform_0(%arg0: i32) -> (i32, i32) {
    %c0_i32 = arith.constant 0 : i32
    %c0_i32_0 = arith.constant 0 : i32
    return %arg0, %c0_i32 : i32, i32
  }
  func.func @transform_1(%arg0: i32) -> (i32, i32) {
    %c0_i32 = arith.constant 0 : i32
    %c0_i32_0 = arith.constant 0 : i32
    return %arg0, %c0_i32 : i32, i32
  }
}

</mosaic_0001>

<bundles_post_ra>
// kernel: tpu_custom_call.1
= control target key start
LH: loop header
LB: loop body
LE: loop exit
PB: predicated region body
PF: predicated region fallthrough
CT: control target
= control target key end

     0   :  { %6 = vsyncpa [#allocation3], 0  ;;  %s118_s0 = inlined_call_operand.hbm [shape: f32[8,512], index: 0, kind: input, shape index: {}]   ;;  %s119_s1 = inlined_call_operand.hbm [shape: f32[8,512], index: 1, kind: output, shape index: {}]  }
   0x1   :  { %7 = vsyncpa [#allocation4], 0  ;;  %s99_s6 = smov [#allocation2]  }
   0x2   :  { %s14_s7 = sshll.u32 %s99_s6, 4  ;;  %s15_s7 = int_to_ptr.vmem [resolvable:$true] %s14_s7 }
   0x3   :  { %s63_s8 = scalar_lea.vmem %s15_s7, 512  ;;  %p68_p1 = scmp.lt.s32.totalorder %s15_s7, %s15_s7 }
   0x4   :  { %p64_p0 = scmp.ne.s32.totalorder %s15_s7, %s63_s8  ;;  %p69_p2 = scmp.lt.s32.totalorder %s63_s8, %s63_s8 }
   0x6   :  { %p70_p3 = por %p69_p2, %p68_p1 }
   0x8   :  { %p71_p4 = pnand %p70_p3, %p64_p0 }
   0xa   :  { %74 = shalt.err (!%p71_p4)
}
   0xb   :  { %17 = dma.hbm_to_vmem [thread:$0]  %s118_s0, 512, %s15_s7, [#allocation3]  }
   0xc   :  { %95 = dma.done.wait [#allocation3], 512  }
   0xd   :  { %96 = vsyncadd [#allocation3], 4294966784  ;;  %s100_s11 = smov [#allocation5]   ;;  %v21_v0 = vld [vmem:[#allocation2] sm:$0xff]  ;;  %v22_v1 = vld [vmem:[#allocation2 + $0x8] sm:$0xff]  ;;  %v101_v4 = vmov -1.0  }
   0xe   :  { %s43_s12 = sshll.u32 %s100_s11, 4  ;;  %v23_v2 = vld [vmem:[#allocation2 + $0x10] sm:$0xff]  ;;  %vm25_vm0 = vcmp.ge.f32.partialorder %v21_v0, 0.0  ;;  %vm26_vm1 = vcmp.ge.f32.partialorder %v22_v1, 0.0  ;;  %v24_v3 = vld [vmem:[#allocation2 + $0x18] sm:$0xff]  ;;  %s44_s12 = int_to_ptr.vmem [resolvable:$true] %s43_s12 }
   0xf   :  { %vm27_vm2 = vcmp.ge.f32.partialorder %v23_v2, 0.0  ;;  %v29_v5 = vsel %vm25_vm0, 1.0, %v101_v4  ;;  %v30_v6 = vsel %vm26_vm1, 1.0, %v101_v4  ;;  %vm28_vm3 = vcmp.ge.f32.partialorder %v24_v3, 0.0  ;;  %s75_s0 = scalar_lea.vmem %s44_s12, 512  ;;  %p80_p6 = scmp.lt.s32.totalorder %s44_s12, %s44_s12 }
  0x10   :  { %v31_v7 = vsel %vm27_vm2, 1.0, %v101_v4  ;;  %33 = vst [vmem:[#allocation5] sm:$0xff] %v29_v5  ;;  %34 = vst [vmem:[#allocation5 + $0x8] sm:$0xff] %v30_v6  ;;  %v32_v8 = vsel %vm28_vm3, 1.0, %v101_v4  ;;  %p76_p5 = scmp.ne.s32.totalorder %s44_s12, %s75_s0  ;;  %p81_p7 = scmp.lt.s32.totalorder %s75_s0, %s75_s0 }
  0x11   :  { %35 = vst [vmem:[#allocation5 + $0x10] sm:$0xff] %v31_v7  ;;  %36 = vst [vmem:[#allocation5 + $0x18] sm:$0xff] %v32_v8 }
  0x12   :  { %p82_p8 = por %p81_p7, %p80_p6 }
  0x14   :  { %p83_p9 = pnand %p82_p8, %p76_p5 }
  0x16   :  { %86 = shalt.err (!%p83_p9)
}
  0x17   :  { %46 = dma.vmem_to_hbm [thread:$0]  %s44_s12, 512, %s119_s1, [#allocation4]  }
  0x18   :  { %97 = dma.done.wait [#allocation4], 512  }
  0x19   :  { %98 = vsyncadd [#allocation4], 4294966784 }
  0x1a   :  { %50 = vsyncpa [#allocation3], 1 }
  0x1b   :  { %51 = vsyncpa [#allocation4], 1 }

</bundles_post_ra>
